<compile_context>
chip_gen: v6e
topology: v6e:2x2x1
jax: 0.10.0
libtpu: 0.0.40
codegen_flags: <defaults>
</compile_context>

<pallas_src>
import jax
import jax.numpy as jnp
from jax.experimental import pallas as pl
from jax.experimental.pallas import tpu as pltpu


def _round_up(x, m):
    return ((x + m - 1) // m) * m


def _contract_kernel(x_ref, k_ref, o_ref):
    # One (bt, I*S) x (I*S, O_pad) matmul per grid step; f32 accumulation on
    # the MXU.  Inputs/weights are pre-cast in the wrapper (no per-step casts).
    o_ref[...] = jnp.dot(
        x_ref[...], k_ref[...], preferred_element_type=jnp.float32
    ).astype(o_ref.dtype)


def learnable_kernel_forward(hist, weight, *, batch_tile=256, compute_dtype=None):
    """hist: (B, I, S) real; weight: (O, I, >= S//2+1) complex -> (B, O) real."""
    B, I, S = hist.shape
    O = weight.shape[0]
    F = S // 2 + 1
    assert weight.shape[1] == I and weight.shape[-1] >= F

    # ---- parameter-only preprocessing: exact folding of rfft/irfft ---------
    w_time = jnp.fft.irfft(weight[..., :F], n=S, axis=-1)   # (O, I, S) real
    k_eff = jnp.flip(w_time, axis=-1)                       # K[o,i,s] = w_time[o,i,S-1-s]

    cdt = jnp.dtype(compute_dtype) if compute_dtype is not None else jnp.dtype(hist.dtype)
    ISz = I * S
    # Lane-dense output stores / full MXU columns: pad O to a multiple of 128.
    O_pad = _round_up(max(O, 1), 128)
    k_mat = jnp.reshape(k_eff, (O, ISz)).T                        # (I*S, O)
    k_mat = jnp.pad(k_mat, ((0, 0), (0, O_pad - O))).astype(cdt)  # cast hoisted out of kernel

    x = jnp.reshape(hist, (B, ISz)).astype(cdt)
    # Large batch tiles keep MXU rows full and amortize per-grid-step overhead;
    # clamp for small B and pad so ragged batch sizes are handled.
    bt = min(_round_up(batch_tile, 8), _round_up(B, 8))
    B_pad = _round_up(B, bt)
    if B_pad != B:
        x = jnp.pad(x, ((0, B_pad - B), (0, 0)))
    grid = (B_pad // bt,)

    itemsize = jnp.dtype(cdt).itemsize
    vmem_bytes = (2 * bt * ISz * itemsize        # double-buffered hist tiles
                  + 2 * ISz * O_pad * itemsize   # resident (double-buffered) kernel
                  + 2 * bt * O_pad * 4)          # double-buffered output tiles
    vmem_limit = int(1.5 * vmem_bytes) if vmem_bytes > (12 << 20) else None

    # TODO(synk): for very large I*S (folded kernel no longer VMEM-resident),
    # add a second 'arbitrary' grid axis over the contraction dim with a VMEM
    # f32 accumulator (init/finalize via pl.when); not needed at these sizes.
    out = pl.pallas_call(
        _contract_kernel,
        out_shape=jax.ShapeDtypeStruct((B_pad, O_pad), jnp.float32),
        grid_spec=pltpu.PrefetchScalarGridSpec(
            num_scalar_prefetch=0,
            grid=grid,
            in_specs=[
                pl.BlockSpec((bt, ISz), lambda i: (i, 0)),     # hist tile (streamed)
                pl.BlockSpec((ISz, O_pad), lambda i: (0, 0)),  # folded kernel (resident)
            ],
            out_specs=pl.BlockSpec((bt, O_pad), lambda i: (i, 0)),
        ),
        compiler_params=pltpu.CompilerParams(
            dimension_semantics=("parallel",),
            vmem_limit_bytes=vmem_limit,
        ),
        cost_estimate=pl.CostEstimate(
            flops=2 * B_pad * ISz * O_pad,
            transcendentals=0,
            bytes_accessed=(x.size * x.dtype.itemsize
                            + k_mat.size * k_mat.dtype.itemsize
                            + B_pad * O_pad * 4),
        ),
    )(x, k_mat)
    return out[:B, :O]


if __name__ == "__main__":
    B, in_ch, out_ch, S = 8, 2, 3, 32

    key = jax.random.PRNGKey(0)
    kh, kr, ki = jax.random.split(key, 3)
    hist = jax.random.normal(kh, (B, in_ch, S), dtype=jnp.float32)
    w_re = jax.random.normal(kr, (out_ch, in_ch, S), dtype=jnp.float32)
    w_im = jax.random.normal(ki, (out_ch, in_ch, S), dtype=jnp.float32)
    weight = (w_re + 1j * w_im).astype(jnp.complex64)   # mirrors torch.cfloat parameter

    out = learnable_kernel_forward(hist, weight)
    jax.block_until_ready(out)

    # Pure-JAX reference mirroring the PyTorch forward exactly.
    hist_ft = jnp.fft.rfft(hist, axis=-1)                            # (B, I, F)
    w_ft = weight[..., : hist_ft.shape[-1]]                          # (O, I, F)
    conv_ft = (hist_ft[:, None, :, :] * w_ft[None, :, :, :]).sum(2)  # (B, O, F)
    conv = jnp.fft.irfft(conv_ft, n=S, axis=-1)                      # (B, O, S)
    ref = conv[..., -1]                                              # (B, O)

    assert out.shape == (B, out_ch)
    # Tolerance allows for the MXU evaluating f32 matmuls via bf16 operand
    # passes under default precision.
    assert jnp.allclose(out, ref, atol=3e-2, rtol=3e-2), float(jnp.max(jnp.abs(out - ref)))

    print("KERNEL_OK")
</pallas_src>

<mosaic_0001>
module attributes {stable_mosaic.version = 11 : i64} {
  func.func @_contract_kernel(%arg0: i32, %arg1: memref<8x64xf32, #tpu.memory_space<vmem>>, %arg2: memref<64x128xf32, #tpu.memory_space<vmem>>, %arg3: memref<8x128xf32, #tpu.memory_space<vmem>>) attributes {dimension_semantics = [#tpu.dimension_semantics<parallel>], iteration_bounds = array<i64: 1>, scalar_prefetch = 0 : i64, scratch_operands = 0 : i64, tpu.core_type = #tpu.core_type<tc>, window_params = [{transform_indices = @transform_0, window_bounds = array<i64: 8, 64>}, {pipeline_mode = #tpu.pipeline_mode<synchronous>, transform_indices = @transform_1, window_bounds = array<i64: 64, 128>}, {transform_indices = @transform_2, window_bounds = array<i64: 8, 128>}]} {
    %c0 = arith.constant 0 : index
    %c0_0 = arith.constant 0 : index
    %0 = vector.load %arg1[%c0, %c0_0] : memref<8x64xf32, #tpu.memory_space<vmem>>, vector<8x64xf32>
    %c0_1 = arith.constant 0 : index
    %c0_2 = arith.constant 0 : index
    %1 = vector.load %arg2[%c0_1, %c0_2] : memref<64x128xf32, #tpu.memory_space<vmem>>, vector<64x128xf32>
    %cst = arith.constant dense<0.000000e+00> : vector<8x128xf32>
    %2 = tpu.matmul %0, %1, %cst {dimension_numbers = #tpu.dot_dimension_numbers<[1], [0], [0], [1], [0, 0, 1, 1], [], []>} : vector<8x64xf32>, vector<64x128xf32>, vector<8x128xf32> -> vector<8x128xf32>
    %c0_3 = arith.constant 0 : index
    %c0_4 = arith.constant 0 : index
    %3 = vector.load %arg3[%c0_3, %c0_4] : memref<8x128xf32, #tpu.memory_space<vmem>>, vector<8x128xf32>
    tpu.vector_store %arg3[%c0_3, %c0_4], %2 {strides = array<i32>} : memref<8x128xf32, #tpu.memory_space<vmem>>, vector<8x128xf32>,
    return
  }
  func.func @transform_0(%arg0: i32) -> (i32, i32) {
    %c0_i32 = arith.constant 0 : i32
    %c0_i32_0 = arith.constant 0 : i32
    return %arg0, %c0_i32 : i32, i32
  }
  func.func @transform_1(%arg0: i32) -> (i32, i32) {
    %c0_i32 = arith.constant 0 : i32
    %c0_i32_0 = arith.constant 0 : i32
    %c0_i32_1 = arith.constant 0 : i32
    return %c0_i32, %c0_i32_0 : i32, i32
  }
  func.func @transform_2(%arg0: i32) -> (i32, i32) {
    %c0_i32 = arith.constant 0 : i32
    %c0_i32_0 = arith.constant 0 : i32
    return %arg0, %c0_i32 : i32, i32
  }
}

</mosaic_0001>

<bundles_post_ra>
// kernel: tpu_custom_call.1
= control target key start
LH: loop header
LB: loop body
LE: loop exit
PB: predicated region body
PF: predicated region fallthrough
CT: control target
= control target key end

     0   :  { %7 = vsyncpa [#allocation3], 0  ;;  %s271_s0 = inlined_call_operand.hbm [shape: f32[8,64], index: 0, kind: input, shape index: {}]   ;;  %s272_s1 = inlined_call_operand.hbm [shape: f32[64,128], index: 1, kind: input, shape index: {}]   ;;  %s273_s2 = inlined_call_operand.hbm [shape: f32[8,128], index: 2, kind: output, shape index: {}]  }
   0x1   :  { %8 = vsyncpa [#allocation6], 0 }
   0x2   :  { %9 = vsyncpa [#allocation4], 0  ;;  %s240_s9 = smov [#allocation2]   ;;  %s241_s11 = smov [#allocation5]  }
   0x3   :  { %s16_s10 = sshll.u32 %s240_s9, 4  ;;  %s25_s12 = sshll.u32 %s241_s11, 4  ;;  %s17_s10 = int_to_ptr.vmem [resolvable:$true] %s16_s10  ;;  %s26_s12 = int_to_ptr.vmem [resolvable:$true] %s25_s12 }
   0x4   :  { %s182_s13 = scalar_lea.vmem %s17_s10, 128  ;;  %p187_p1 = scmp.lt.s32.totalorder %s17_s10, %s17_s10 }
   0x5   :  { %p183_p0 = scmp.ne.s32.totalorder %s17_s10, %s182_s13  ;;  %p188_p2 = scmp.lt.s32.totalorder %s182_s13, %s182_s13 }
   0x7   :  { %p189_p3 = por %p188_p2, %p187_p1 }
   0x9   :  { %p190_p4 = pnand %p189_p3, %p183_p0 }
   0xb   :  { %193 = shalt.err (!%p190_p4)
}
   0xc   :  { %19 = dma.hbm_to_vmem [thread:$0]  %s271_s0, 128, %s17_s10, [#allocation3]  }
   0xd   :  { %s202_s16 = scalar_lea.vmem %s26_s12, 1024  ;;  %p207_p6 = scmp.lt.s32.totalorder %s26_s12, %s26_s12 }
   0xe   :  { %p203_p5 = scmp.ne.s32.totalorder %s26_s12, %s202_s16  ;;  %p208_p7 = scmp.lt.s32.totalorder %s202_s16, %s202_s16 }
  0x10   :  { %p209_p8 = por %p208_p7, %p207_p6 }
  0x12   :  { %p210_p9 = pnand %p209_p8, %p203_p5 }
  0x14   :  { %213 = shalt.err (!%p210_p9)
}
  0x15   :  { %s242_s17 = smov 128   ;;  %s243_s18 = smov 8  }
  0x16   :  { %31 = dma.hbm_to_vmem [thread:$0]  %s272_s1, 1024, %s26_s12, [#allocation6], %s242_s17, %s242_s17, %s243_s18  }
  0x17   :  { %234 = dma.done.wait [#allocation3], 128  }
  0x18   :  { %235 = vsyncadd [#allocation3], 4294967168 }
  0x19   :  { %236 = dma.done.wait [#allocation6], 1024  }
  0x1a   :  { %237 = vsyncadd [#allocation6], 4294966272  ;;  %v244_v0 = vmov 0.0   ;;  %vm245_vm0 = vmmov 0   ;;  %v46_v1 = vld [vmem:[#allocation5 + $0x38] sm:$0xff]  ;;  %v45_v2 = vld [vmem:[#allocation5 + $0x30] sm:$0xff] }
  0x1b   :  { %148 = vmatprep.subr.mxu0 %v244_v0  ;;  %164 = vmatprep.mubr.msk.f32.mxu0 %vm245_vm0, %v244_v0  ;;  %v44_v3 = vld [vmem:[#allocation5 + $0x28] sm:$0xff]  ;;  %v43_v4 = vld [vmem:[#allocation5 + $0x20] sm:$0xff]  ;;  %v42_v5 = vld [vmem:[#allocation5 + $0x18] sm:$0xff]  ;;  %vm47_vm1 = vcmask 523264   ;;  %s246_s0 = smov [#allocation7]  }
  0x1c   :  { %149 = vmatpush3.msra.mxu0 %v46_v1  ;;  %v41_v6 = vld [vmem:[#allocation5 + $0x10] sm:$0xff]  ;;  %v40_v7 = vld [vmem:[#allocation5 + $0x8] sm:$0xff]  ;;  %v39_v8 = vld [vmem:[#allocation5] sm:$0xff]  ;;  %s128_s1 = sshll.u32 %s246_s0, 4  ;;  %s129_s1 = int_to_ptr.vmem [resolvable:$true] %s128_s1 }
  0x1d   :  { %150 = vmatprep.subr.mxu0 %v244_v0  ;;  %v38_v9 = vld [vmem:[#allocation2] sm:$0xff]  ;;  %s214_s21 = scalar_lea.vmem %s129_s1, 128  ;;  %p219_p11 = scmp.lt.s32.totalorder %s129_s1, %s129_s1 }
  0x1e   :  { %151 = vmatpush3.msra.mxu0 %v45_v2  ;;  %p215_p10 = scmp.ne.s32.totalorder %s129_s1, %s214_s21  ;;  %p220_p12 = scmp.lt.s32.totalorder %s214_s21, %s214_s21 }
  0x1f   :  { %152 = vmatprep.subr.mxu0 %v244_v0 }
  0x20   :  { %153 = vmatpush3.msra.mxu0 %v44_v3  ;;  %p221_p13 = por %p220_p12, %p219_p11 }
  0x21   :  { %154 = vmatprep.subr.mxu0 %v244_v0 }
  0x22   :  { %155 = vmatpush3.msra.mxu0 %v43_v4  ;;  %p222_p0 = pnand %p221_p13, %p215_p10 }
  0x23   :  { %156 = vmatprep.subr.mxu0 %v244_v0 }
  0x24   :  { %157 = vmatpush3.msra.mxu0 %v42_v5 }
  0x25   :  { %158 = vmatprep.subr.mxu0 %v244_v0 }
  0x26   :  { %159 = vmatpush3.msra.mxu0 %v41_v6 }
  0x27   :  { %160 = vmatprep.subr.mxu0 %v244_v0 }
  0x28   :  { %161 = vmatpush3.msra.mxu0 %v40_v7 }
  0x29   :  { %162 = vmatprep.subr.mxu0 %v244_v0 }
  0x2a   :  { %163 = vmatpush3.msra.mxu0 %v39_v8 }
  0x2b   :  { %165 = vmatmul.mubr.msk.f32.vlgmr.msra.gmra.mxu0 %vm47_vm1, %v38_v9 }
  0xeb   :  { %v117_v10 = vpop.f32.mrf.mxu0 }
  0xec   :  { %121 = vst [vmem:[#allocation7] sm:$0xff] %v117_v10 }
  0xed   :  { %v166_v11 = vpop.f32.mrf.mxu0 }
  0xee   :  { %225 = shalt.err (!%p222_p0)
}
  0xef   :  { %131 = dma.vmem_to_hbm [thread:$0]  %s129_s1, 128, %s273_s2, [#allocation4]  }
  0xf0   :  { %238 = dma.done.wait [#allocation4], 128  }
  0xf1   :  { %239 = vsyncadd [#allocation4], 4294967168 }
  0xf2   :  { %135 = vsyncpa [#allocation3], 1 }
  0xf3   :  { %136 = vsyncpa [#allocation6], 1 }
  0xf4   :  { %137 = vsyncpa [#allocation4], 1 }

</bundles_post_ra>
